<compile_context>
chip_gen: v5e
topology: v5e:2x2
jax: 0.10.0
libtpu: 0.0.40
codegen_flags: <defaults>
</compile_context>

<pallas_src>
import numpy as np

import jax
import jax.numpy as jnp
from jax import lax
from jax.experimental import pallas as pl
from jax.experimental.pallas import tpu as pltpu

EPS = 1e-5
_HIGHEST = lax.Precision.HIGHEST  # keep f32 accuracy through the MXU reduce/broadcast


# ---------------------------------------------------------------------------
# Generation-aware knobs & blocking helpers
# ---------------------------------------------------------------------------
def _hw_config():
    """Block-size / VMEM knobs per TPU generation."""
    vmem_bytes = None
    try:
        vmem_bytes = int(getattr(pltpu.get_tpu_info(), "vmem_capacity_bytes", 0)) or None
    except Exception:
        vmem_bytes = None
    if vmem_bytes is not None and vmem_bytes >= (100 << 20):
        # v5e / v6e class: 128 MiB VMEM, single TensorCore -> big blocks.
        return dict(target_block_bytes=6 << 20, vmem_limit=64 << 20,
                    min_steps=1, prefer_even_steps=False)
    # v7x class (64 MiB VMEM / TC, 2 TCs) or unknown: conservative blocks,
    # prefer an even step count >= 4 so both cores get work.
    return dict(target_block_bytes=3 << 20, vmem_limit=40 << 20,
                min_steps=4, prefer_even_steps=True)


def _round_up(n, m):
    return ((n + m - 1) // m) * m


def _pick_block_rows(n_rows, bytes_per_row, hw):
    """Largest divisor of n_rows (multiple of 8 for sublane density unless it is
    the full extent) fitting the per-step byte target, biased toward >= min_steps
    (and even) grid steps for megacore sharding."""
    cands = [d for d in range(1, n_rows + 1)
             if n_rows % d == 0 and (d == n_rows or d % 8 == 0)]
    fitting = [d for d in cands if d * bytes_per_row <= hw["target_block_bytes"]]
    if not fitting:
        fitting = [min(cands)]

    def _good(d):
        steps = n_rows // d
        if steps < hw["min_steps"]:
            return False
        if hw["prefer_even_steps"] and steps % 2 != 0:
            return False
        return True

    preferred = [d for d in fitting if _good(d)]
    return max(preferred) if preferred else max(fitting)


def _channel_matrices(T, C):
    """P[l, c] = 1 iff flat position l = t*C + c belongs to channel c (plus its
    transpose).  Lets the idle MXU do the stride-C reduction over T and the
    per-channel -> per-element broadcast on the lane-dense (rows, T*C) layout."""
    lane_ch = np.arange(T * C) % C
    p = (lane_ch[:, None] == np.arange(C)[None, :]).astype(np.float32)  # (L, C)
    return jnp.asarray(p), jnp.asarray(p.T)                             # and (C, L)


def _use_flat_layout(T, C):
    # Flat path keeps the (T*C, C) one-hot matrix resident in VMEM (lane-padded).
    return C < 128 and (T * C * 128 * 4) <= (8 << 20)


def _compiler_params(hw):
    return pltpu.CompilerParams(dimension_semantics=("parallel",),
                                vmem_limit_bytes=hw["vmem_limit"])


# ---------------------------------------------------------------------------
# Kernels — flat lane-dense path (small C, typical RevIN)
# ---------------------------------------------------------------------------
def _revin_norm_flat_kernel(x_ref, p_ref, pt_ref, w_ref, bflat_ref, y_ref, stats_ref):
    x = x_ref[...].astype(jnp.float32)               # (bb, L=T*C), lane-dense
    p = p_ref[...]                                   # (L, C)
    pt = pt_ref[...]                                 # (C, L)
    num_ch = p.shape[1]
    inv_t = jnp.float32(num_ch / x.shape[1])         # = 1 / T
    # Per-(row, channel) mean via MXU strided reduction (MXU otherwise idle).
    mean = jnp.dot(x, p, precision=_HIGHEST,
                   preferred_element_type=jnp.float32) * inv_t           # (bb, C)
    mean_t = jnp.dot(mean, pt, precision=_HIGHEST,
                     preferred_element_type=jnp.float32)                 # (bb, L)
    xc = x - mean_t                                  # reused for variance AND output
    var = jnp.dot(xc * xc, p, precision=_HIGHEST,
                  preferred_element_type=jnp.float32) * inv_t            # two-pass var
    std = jnp.sqrt(var + EPS)                        # (bb, C), unbiased=False
    scale = w_ref[...] * (1.0 / std)                 # only O(bb*C) divisions
    scale_t = jnp.dot(scale, pt, precision=_HIGHEST,
                      preferred_element_type=jnp.float32)                # (bb, L)
    y_ref[...] = (xc * scale_t + bflat_ref[...]).astype(y_ref.dtype)     # one dense FMA
    stats_ref[...] = jnp.concatenate([mean, std], axis=1)                # packed (bb, 2C)


def _revin_denorm_flat_kernel(x_ref, mean_ref, std_ref, pt_ref, invw_ref, b_ref, y_ref):
    x = x_ref[...].astype(jnp.float32)               # (bb, L)
    scale = std_ref[...] * invw_ref[...]             # (bb, C): std / (w + eps^2)
    shift = mean_ref[...] - b_ref[...] * scale       # (bb, C)
    pt = pt_ref[...]
    scale_t = jnp.dot(scale, pt, precision=_HIGHEST, preferred_element_type=jnp.float32)
    shift_t = jnp.dot(shift, pt, precision=_HIGHEST, preferred_element_type=jnp.float32)
    y_ref[...] = (x * scale_t + shift_t).astype(y_ref.dtype)


# ---------------------------------------------------------------------------
# Kernels — wide-channel path (C >= 128, natural layout already lane-dense)
# ---------------------------------------------------------------------------
def _revin_norm_wide_kernel(x_ref, w_ref, b_ref, y_ref, stats_ref):
    x = x_ref[...].astype(jnp.float32)               # (bb, T, C)
    mean = jnp.mean(x, axis=1, keepdims=True)
    xc = x - mean
    var = jnp.mean(xc * xc, axis=1, keepdims=True)   # two-pass, unbiased=False
    std = jnp.sqrt(var + EPS)
    scale = w_ref[...] * (1.0 / std)                 # (bb, 1, C)
    shift = b_ref[...] - mean * scale
    y_ref[...] = (x * scale + shift).astype(y_ref.dtype)       # single FMA pass
    stats_ref[...] = jnp.concatenate([mean, std], axis=1)      # packed (bb, 2, C)


def _revin_denorm_wide_kernel(x_ref, mean_ref, std_ref, invw_ref, b_ref, y_ref):
    x = x_ref[...].astype(jnp.float32)
    scale = std_ref[...] * invw_ref[...]             # (bb, 1, C)
    shift = mean_ref[...] - b_ref[...] * scale
    y_ref[...] = (x * scale + shift).astype(y_ref.dtype)


# ---------------------------------------------------------------------------
# Wrappers (PyTorch-layout API: x is (B, T, C))
# ---------------------------------------------------------------------------
def revin_norm(x, affine_weight, affine_bias):
    """mode == 'norm'.  Returns (x_norm, mean (B,1,C), stdev (B,1,C))."""
    B, T, C = x.shape
    hw = _hw_config()

    if _use_flat_layout(T, C):
        L = T * C
        x_flat = x.reshape(B, L)                     # free: merges contiguous minor dims
        p, pt = _channel_matrices(T, C)
        w2 = affine_weight.astype(jnp.float32).reshape(1, C)
        b_flat = jnp.tile(affine_bias.astype(jnp.float32).reshape(1, C), (1, T))  # (1, L)
        bytes_per_row = _round_up(L, 128) * 4 * 6    # ~live f32 copies per batch row
        bb = _pick_block_rows(B, bytes_per_row, hw)
        grid = (B // bb,)

        y_flat, stats = pl.pallas_call(
            _revin_norm_flat_kernel,
            out_shape=(jax.ShapeDtypeStruct((B, L), x.dtype),
                       jax.ShapeDtypeStruct((B, 2 * C), jnp.float32)),
            grid_spec=pltpu.PrefetchScalarGridSpec(
                num_scalar_prefetch=0,
                grid=grid,
                in_specs=[
                    pl.BlockSpec((bb, L), lambda i: (i, 0)),
                    pl.BlockSpec((L, C), lambda i: (0, 0)),
                    pl.BlockSpec((C, L), lambda i: (0, 0)),
                    pl.BlockSpec((1, C), lambda i: (0, 0)),
                    pl.BlockSpec((1, L), lambda i: (0, 0)),
                ],
                out_specs=[
                    pl.BlockSpec((bb, L), lambda i: (i, 0)),
                    pl.BlockSpec((bb, 2 * C), lambda i: (i, 0)),
                ],
            ),
            compiler_params=_compiler_params(hw),
        )(x_flat, p, pt, w2, b_flat)

        y = y_flat.reshape(B, T, C)                  # free (minor-dim split)
        mean = stats[:, 0:C].reshape(B, 1, C)
        std = stats[:, C:2 * C].reshape(B, 1, C)
        return y, mean, std

    # Wide-channel path: C itself is lane-dense, keep natural (bb, T, C) blocks.
    # TODO(synk): for very large T (one batch row's slab > VMEM target) add a T grid
    # axis marked "arbitrary" accumulating sum/sum-sq in scratch, finalized via pl.when.
    w3 = affine_weight.astype(jnp.float32).reshape(1, 1, C)
    b3 = affine_bias.astype(jnp.float32).reshape(1, 1, C)
    bytes_per_row = T * _round_up(C, 128) * 4 * 4
    bb = _pick_block_rows(B, bytes_per_row, hw)
    grid = (B // bb,)

    y, stats = pl.pallas_call(
        _revin_norm_wide_kernel,
        out_shape=(jax.ShapeDtypeStruct((B, T, C), x.dtype),
                   jax.ShapeDtypeStruct((B, 2, C), jnp.float32)),
        grid_spec=pltpu.PrefetchScalarGridSpec(
            num_scalar_prefetch=0,
            grid=grid,
            in_specs=[
                pl.BlockSpec((bb, T, C), lambda i: (i, 0, 0)),
                pl.BlockSpec((1, 1, C), lambda i: (0, 0, 0)),
                pl.BlockSpec((1, 1, C), lambda i: (0, 0, 0)),
            ],
            out_specs=[
                pl.BlockSpec((bb, T, C), lambda i: (i, 0, 0)),
                pl.BlockSpec((bb, 2, C), lambda i: (i, 0, 0)),
            ],
        ),
        compiler_params=_compiler_params(hw),
    )(x, w3, b3)
    return y, stats[:, 0:1, :], stats[:, 1:2, :]


def revin_denorm(x, mean, stdev, affine_weight, affine_bias):
    """mode == 'denorm'.  Uses the statistics captured during 'norm'."""
    B, T, C = x.shape
    hw = _hw_config()
    # O(C) precompute: keep the reciprocal out of the per-element path.
    inv_w = 1.0 / (affine_weight.astype(jnp.float32) + EPS * EPS)

    if _use_flat_layout(T, C):
        L = T * C
        x_flat = x.reshape(B, L)
        _, pt = _channel_matrices(T, C)
        mean2 = mean.astype(jnp.float32).reshape(B, C)
        std2 = stdev.astype(jnp.float32).reshape(B, C)
        invw2 = inv_w.reshape(1, C)
        b2 = affine_bias.astype(jnp.float32).reshape(1, C)
        bytes_per_row = _round_up(L, 128) * 4 * 4
        bb = _pick_block_rows(B, bytes_per_row, hw)
        grid = (B // bb,)

        y_flat = pl.pallas_call(
            _revin_denorm_flat_kernel,
            out_shape=jax.ShapeDtypeStruct((B, L), x.dtype),
            grid_spec=pltpu.PrefetchScalarGridSpec(
                num_scalar_prefetch=0,
                grid=grid,
                in_specs=[
                    pl.BlockSpec((bb, L), lambda i: (i, 0)),
                    pl.BlockSpec((bb, C), lambda i: (i, 0)),
                    pl.BlockSpec((bb, C), lambda i: (i, 0)),
                    pl.BlockSpec((C, L), lambda i: (0, 0)),
                    pl.BlockSpec((1, C), lambda i: (0, 0)),
                    pl.BlockSpec((1, C), lambda i: (0, 0)),
                ],
                out_specs=pl.BlockSpec((bb, L), lambda i: (i, 0)),
            ),
            compiler_params=_compiler_params(hw),
        )(x_flat, mean2, std2, pt, invw2, b2)
        return y_flat.reshape(B, T, C)

    mean3 = mean.astype(jnp.float32).reshape(B, 1, C)
    std3 = stdev.astype(jnp.float32).reshape(B, 1, C)
    invw3 = inv_w.reshape(1, 1, C)
    b3 = affine_bias.astype(jnp.float32).reshape(1, 1, C)
    bytes_per_row = T * _round_up(C, 128) * 4 * 3
    bb = _pick_block_rows(B, bytes_per_row, hw)
    grid = (B // bb,)

    y = pl.pallas_call(
        _revin_denorm_wide_kernel,
        out_shape=jax.ShapeDtypeStruct((B, T, C), x.dtype),
        grid_spec=pltpu.PrefetchScalarGridSpec(
            num_scalar_prefetch=0,
            grid=grid,
            in_specs=[
                pl.BlockSpec((bb, T, C), lambda i: (i, 0, 0)),
                pl.BlockSpec((bb, 1, C), lambda i: (i, 0, 0)),
                pl.BlockSpec((bb, 1, C), lambda i: (i, 0, 0)),
                pl.BlockSpec((1, 1, C), lambda i: (0, 0, 0)),
                pl.BlockSpec((1, 1, C), lambda i: (0, 0, 0)),
            ],
            out_specs=pl.BlockSpec((bb, T, C), lambda i: (i, 0, 0)),
        ),
        compiler_params=_compiler_params(hw),
    )(x, mean3, std3, invw3, b3)
    return y


# ---------------------------------------------------------------------------
# Pure-JAX reference (mirrors the PyTorch module) and checks
# ---------------------------------------------------------------------------
def _ref_norm(x, w, b):
    xf = x.astype(jnp.float32)
    mean = jnp.mean(xf, axis=1, keepdims=True)
    std = jnp.sqrt(jnp.var(xf, axis=1, keepdims=True) + EPS)
    y = (xf - mean) / std * w + b
    return y.astype(x.dtype), mean, std


def _ref_denorm(x, mean, std, w, b):
    xf = x.astype(jnp.float32)
    y = (xf - b) / (w + EPS * EPS) * std + mean
    return y.astype(x.dtype)


def _check(name, got, want, atol, rtol):
    got = jnp.asarray(got, jnp.float32)
    want = jnp.asarray(want, jnp.float32)
    ok = bool(jnp.allclose(got, want, atol=atol, rtol=rtol))
    err = float(jnp.max(jnp.abs(got - want)))
    assert ok, f"{name} mismatch (max abs err {err})"


if __name__ == "__main__":
    key = jax.random.PRNGKey(0)
    k0, k1, k2, k3 = jax.random.split(key, 4)

    # --- case 1: typical RevIN shape (few channels -> flat lane-dense path) ---
    B, T, C = 2, 8, 4
    x = jax.random.normal(k0, (B, T, C), dtype=jnp.float32) * 3.0 + 1.5
    w = jnp.ones((C,), jnp.float32)          # RevIN._init_params
    b = jnp.zeros((C,), jnp.float32)
    y, mean, std = jax.block_until_ready(revin_norm(x, w, b))
    x_rec = jax.block_until_ready(revin_denorm(y, mean, std, w, b))
    y_r, m_r, s_r = _ref_norm(x, w, b)
    x_rec_r = _ref_denorm(y_r, m_r, s_r, w, b)
    _check("norm", y, y_r, 1e-5, 1e-4)
    _check("mean", mean, m_r, 1e-5, 1e-4)
    _check("stdev", std, s_r, 1e-5, 1e-4)
    _check("denorm", x_rec, x_rec_r, 1e-5, 1e-4)
    _check("roundtrip", x_rec, x, 1e-3, 1e-3)

    # --- case 2: lane-aligned channel count (wide channels-last path) --------
    B2, T2, C2 = 2, 16, 128
    x2 = jax.random.normal(k1, (B2, T2, C2), jnp.float32) * 2.0 - 0.5
    w2 = 1.0 + 0.1 * jax.random.normal(k2, (C2,), jnp.float32)
    b2 = 0.1 * jax.random.normal(k3, (C2,), jnp.float32)
    y2, mean2, std2 = jax.block_until_ready(revin_norm(x2, w2, b2))
    x2_rec = jax.block_until_ready(revin_denorm(y2, mean2, std2, w2, b2))
    y2_r, m2_r, s2_r = _ref_norm(x2, w2, b2)
    x2_rec_r = _ref_denorm(y2_r, m2_r, s2_r, w2, b2)
    _check("norm(C=128)", y2, y2_r, 1e-5, 1e-4)
    _check("mean(C=128)", mean2, m2_r, 1e-5, 1e-4)
    _check("stdev(C=128)", std2, s2_r, 1e-5, 1e-4)
    _check("denorm(C=128)", x2_rec, x2_rec_r, 1e-5, 1e-4)

    # --- case 3: bf16 HBM I/O (stats stay f32), odd channel count, flat path -
    B3, T3, C3 = 4, 24, 6
    x3 = (jax.random.normal(k3, (B3, T3, C3), jnp.float32) * 2.0 + 0.5).astype(jnp.bfloat16)
    w3 = 1.0 + 0.1 * jax.random.normal(k1, (C3,), jnp.float32)
    b3 = 0.1 * jax.random.normal(k2, (C3,), jnp.float32)
    y3, mean3, std3 = jax.block_until_ready(revin_norm(x3, w3, b3))
    x3_rec = jax.block_until_ready(revin_denorm(y3, mean3, std3, w3, b3))
    y3_r, m3_r, s3_r = _ref_norm(x3, w3, b3)
    _check("norm(bf16)", y3, y3_r, 3e-2, 3e-2)
    _check("mean(bf16)", mean3, m3_r, 1e-5, 1e-4)
    _check("stdev(bf16)", std3, s3_r, 1e-5, 1e-4)
    x3_rec_r = _ref_denorm(y3, mean3, std3, w3, b3)  # denorm from the kernel's own stats
    _check("denorm(bf16)", x3_rec, x3_rec_r, 5e-2, 3e-2)

    print("KERNEL_OK")
</pallas_src>

<mosaic_0001>
module attributes {stable_mosaic.version = 11 : i64} {
  func.func @_revin_norm_flat_kernel(%arg0: i32, %arg1: memref<2x32xf32, #tpu.memory_space<vmem>>, %arg2: memref<32x4xf32, #tpu.memory_space<vmem>>, %arg3: memref<4x32xf32, #tpu.memory_space<vmem>>, %arg4: memref<1x4xf32, #tpu.memory_space<vmem>>, %arg5: memref<1x32xf32, #tpu.memory_space<vmem>>, %arg6: memref<2x32xf32, #tpu.memory_space<vmem>>, %arg7: memref<2x8xf32, #tpu.memory_space<vmem>>) attributes {dimension_semantics = [#tpu.dimension_semantics<parallel>], iteration_bounds = array<i64: 1>, scalar_prefetch = 0 : i64, scratch_operands = 0 : i64, tpu.core_type = #tpu.core_type<tc>, window_params = [{transform_indices = @transform_0, window_bounds = array<i64: 2, 32>}, {pipeline_mode = #tpu.pipeline_mode<synchronous>, transform_indices = @transform_1, window_bounds = array<i64: 32, 4>}, {pipeline_mode = #tpu.pipeline_mode<synchronous>, transform_indices = @transform_2, window_bounds = array<i64: 4, 32>}, {pipeline_mode = #tpu.pipeline_mode<synchronous>, transform_indices = @transform_3, window_bounds = array<i64: 1, 4>}, {pipeline_mode = #tpu.pipeline_mode<synchronous>, transform_indices = @transform_4, window_bounds = array<i64: 1, 32>}, {transform_indices = @transform_5, window_bounds = array<i64: 2, 32>}, {transform_indices = @transform_6, window_bounds = array<i64: 2, 8>}]} {
    %c0 = arith.constant 0 : index
    %c0_0 = arith.constant 0 : index
    %0 = vector.load %arg1[%c0, %c0_0] : memref<2x32xf32, #tpu.memory_space<vmem>>, vector<2x32xf32>
    %c0_1 = arith.constant 0 : index
    %c0_2 = arith.constant 0 : index
    %1 = vector.load %arg2[%c0_1, %c0_2] : memref<32x4xf32, #tpu.memory_space<vmem>>, vector<32x4xf32>
    %c0_3 = arith.constant 0 : index
    %c0_4 = arith.constant 0 : index
    %2 = vector.load %arg3[%c0_3, %c0_4] : memref<4x32xf32, #tpu.memory_space<vmem>>, vector<4x32xf32>
    %cst = arith.constant dense<0.000000e+00> : vector<2x4xf32>
    %3 = tpu.matmul %0, %1, %cst {dimension_numbers = #tpu.dot_dimension_numbers<[1], [0], [0], [1], [0, 0, 1, 1], [], []>, precision = #tpu.contract_precision<fp32>} : vector<2x32xf32>, vector<32x4xf32>, vector<2x4xf32> -> vector<2x4xf32>
    %cst_5 = arith.constant 1.250000e-01 : f32
    %4 = vector.broadcast %cst_5 : f32 to vector<2x4xf32>
    %5 = arith.mulf %3, %4 : vector<2x4xf32>
    %cst_6 = arith.constant dense<0.000000e+00> : vector<2x32xf32>
    %6 = tpu.matmul %5, %2, %cst_6 {dimension_numbers = #tpu.dot_dimension_numbers<[1], [0], [0], [1], [0, 0, 1, 1], [], []>, precision = #tpu.contract_precision<fp32>} : vector<2x4xf32>, vector<4x32xf32>, vector<2x32xf32> -> vector<2x32xf32>
    %7 = arith.subf %0, %6 : vector<2x32xf32>
    %8 = arith.mulf %7, %7 : vector<2x32xf32>
    %cst_7 = arith.constant dense<0.000000e+00> : vector<2x4xf32>
    %9 = tpu.matmul %8, %1, %cst_7 {dimension_numbers = #tpu.dot_dimension_numbers<[1], [0], [0], [1], [0, 0, 1, 1], [], []>, precision = #tpu.contract_precision<fp32>} : vector<2x32xf32>, vector<32x4xf32>, vector<2x4xf32> -> vector<2x4xf32>
    %cst_8 = arith.constant 1.250000e-01 : f32
    %10 = vector.broadcast %cst_8 : f32 to vector<2x4xf32>
    %11 = arith.mulf %9, %10 : vector<2x4xf32>
    %cst_9 = arith.constant 9.99999974E-6 : f32
    %12 = vector.broadcast %cst_9 : f32 to vector<2x4xf32>
    %13 = arith.addf %11, %12 : vector<2x4xf32>
    %14 = math.sqrt %13 : vector<2x4xf32>
    %c0_10 = arith.constant 0 : index
    %c0_11 = arith.constant 0 : index
    %15 = vector.load %arg4[%c0_10, %c0_11] : memref<1x4xf32, #tpu.memory_space<vmem>>, vector<1x4xf32>
    %cst_12 = arith.constant 1.000000e+00 : f32
    %16 = vector.broadcast %cst_12 : f32 to vector<2x4xf32>
    %17 = arith.divf %16, %14 : vector<2x4xf32>
    %18 = vector.broadcast %15 : vector<1x4xf32> to vector<2x4xf32>
    %19 = arith.mulf %18, %17 : vector<2x4xf32>
    %cst_13 = arith.constant dense<0.000000e+00> : vector<2x32xf32>
    %20 = tpu.matmul %19, %2, %cst_13 {dimension_numbers = #tpu.dot_dimension_numbers<[1], [0], [0], [1], [0, 0, 1, 1], [], []>, precision = #tpu.contract_precision<fp32>} : vector<2x4xf32>, vector<4x32xf32>, vector<2x32xf32> -> vector<2x32xf32>
    %21 = arith.mulf %7, %20 : vector<2x32xf32>
    %c0_14 = arith.constant 0 : index
    %c0_15 = arith.constant 0 : index
    %22 = vector.load %arg5[%c0_14, %c0_15] : memref<1x32xf32, #tpu.memory_space<vmem>>, vector<1x32xf32>
    %23 = vector.broadcast %22 : vector<1x32xf32> to vector<2x32xf32>
    %24 = arith.addf %21, %23 : vector<2x32xf32>
    %c0_16 = arith.constant 0 : index
    %c0_17 = arith.constant 0 : index
    %25 = vector.load %arg6[%c0_16, %c0_17] : memref<2x32xf32, #tpu.memory_space<vmem>>, vector<2x32xf32>
    tpu.vector_store %arg6[%c0_16, %c0_17], %24 {strides = array<i32>} : memref<2x32xf32, #tpu.memory_space<vmem>>, vector<2x32xf32>,
    %26 = tpu.concatenate %5, %14 in 1 : vector<2x4xf32>, vector<2x4xf32> -> vector<2x8xf32>
    %c0_18 = arith.constant 0 : index
    %c0_19 = arith.constant 0 : index
    %27 = vector.load %arg7[%c0_18, %c0_19] : memref<2x8xf32, #tpu.memory_space<vmem>>, vector<2x8xf32>
    tpu.vector_store %arg7[%c0_18, %c0_19], %26 {strides = array<i32>} : memref<2x8xf32, #tpu.memory_space<vmem>>, vector<2x8xf32>,
    return
  }
  func.func @transform_0(%arg0: i32) -> (i32, i32) {
    %c0_i32 = arith.constant 0 : i32
    %c0_i32_0 = arith.constant 0 : i32
    return %arg0, %c0_i32 : i32, i32
  }
  func.func @transform_1(%arg0: i32) -> (i32, i32) {
    %c0_i32 = arith.constant 0 : i32
    %c0_i32_0 = arith.constant 0 : i32
    %c0_i32_1 = arith.constant 0 : i32
    return %c0_i32, %c0_i32_0 : i32, i32
  }
  func.func @transform_2(%arg0: i32) -> (i32, i32) {
    %c0_i32 = arith.constant 0 : i32
    %c0_i32_0 = arith.constant 0 : i32
    %c0_i32_1 = arith.constant 0 : i32
    return %c0_i32, %c0_i32_0 : i32, i32
  }
  func.func @transform_3(%arg0: i32) -> (i32, i32) {
    %c0_i32 = arith.constant 0 : i32
    %c0_i32_0 = arith.constant 0 : i32
    %c0_i32_1 = arith.constant 0 : i32
    return %c0_i32, %c0_i32_0 : i32, i32
  }
  func.func @transform_4(%arg0: i32) -> (i32, i32) {
    %c0_i32 = arith.constant 0 : i32
    %c0_i32_0 = arith.constant 0 : i32
    %c0_i32_1 = arith.constant 0 : i32
    return %c0_i32, %c0_i32_0 : i32, i32
  }
  func.func @transform_5(%arg0: i32) -> (i32, i32) {
    %c0_i32 = arith.constant 0 : i32
    %c0_i32_0 = arith.constant 0 : i32
    return %arg0, %c0_i32 : i32, i32
  }
  func.func @transform_6(%arg0: i32) -> (i32, i32) {
    %c0_i32 = arith.constant 0 : i32
    %c0_i32_0 = arith.constant 0 : i32
    return %arg0, %c0_i32 : i32, i32
  }
}

</mosaic_0001>

<bundles_post_ra>
// kernel: tpu_custom_call.1
= control target key start
LH: loop header
LB: loop body
LE: loop exit
PB: predicated region body
PF: predicated region fallthrough
CT: control target
= control target key end

     0   :  { %12 = vsyncpa [#allocation3], 0  ;;  %vm30_vm0 = vcmask 261120   ;;  %s1041_s0 = inlined_call_operand.vmem [shape: f32[2,32], index: 0, kind: input, shape index: {}]   ;;  %s1042_s1 = inlined_call_operand.vmem [shape: f32[32,4], index: 1, kind: input, shape index: {}]   ;;  %s1043_s2 = inlined_call_operand.vmem [shape: f32[4,32], index: 2, kind: input, shape index: {}]   ;;  %s1044_s3 = inlined_call_operand.vmem [shape: f32[1,4], index: 3, kind: input, shape index: {}]   ;;  %s1045_s4 = inlined_call_operand.vmem [shape: f32[1,32], index: 4, kind: input, shape index: {}]   ;;  %s1046_s5 = inlined_call_operand.hbm [shape: f32[2,32], index: 5, kind: output, shape index: {0}]   ;;  %s1047_s6 = inlined_call_operand.hbm [shape: f32[2,8], index: 6, kind: output, shape index: {1}]  }
   0x1   :  { %v28_v0 = vld [vmem:[%s1042_s1 + $0x18] sm:$0xff]  ;;  %v27_v1 = vld [vmem:[%s1042_s1 + $0x10] sm:$0xff]  ;;  %v26_v2 = vld [vmem:[%s1042_s1 + $0x8] sm:$0xff] }
   0x2   :  { %v902_v3 = vand.u32 4294901760, %v28_v0  ;;  %v904_v4 = vand.u32 4294901760, %v27_v1  ;;  %v906_v5 = vand.u32 4294901760, %v26_v2  ;;  %v25_v6 = vld [vmem:[%s1042_s1] sm:$0xff] }
   0x3   :  { %v914_v7 = vld [vmem:[%s1041_s0] sm:$0x3]  ;;  %v916_v8 = vand.u32 4294901760, %v25_v6 }
   0x4   :  { %v32_v9 = vsel %vm30_vm0, %v914_v7, 0  ;;  %v921_v10 = vsub.f32 %v28_v0, %v902_v3  ;;  %47 = vmatpush.msra.mxu0 %v902_v3  ;;  %v925_v11 = vsub.f32 %v27_v1, %v904_v4  ;;  %147 = vmatpush.msra.mxu3 %v902_v3  ;;  %v929_v12 = vsub.f32 %v26_v2, %v906_v5 }
   0x5   :  { %v54_v13 = vand.u32 4294901760, %v32_v9 }
   0x6   :  { %13 = vsyncpa [#allocation5], 0  ;;  %v932_v14 = vsub.f32 %v25_v6, %v916_v8  ;;  %118 = vmatpush.msra.mxu2 %v921_v10  ;;  %49 = vmatpush.msra.mxu0 %v904_v4  ;;  %v937_v15 = vand.u32 4294901760, %v921_v10  ;;  %v940_v16 = vand.u32 4294901760, %v925_v11  ;;  %v943_v18 = vand.u32 4294901760, %v929_v12  ;;  %s780_s12 = sshll.u32 %s1047_s6, 4  ;;  %s781_s12 = int_to_ptr.hbm [resolvable:$true] %s780_s12 }
   0x7   :  { %v55_v17 = vsub.f32 %v32_v9, %v54_v13  ;;  %149 = vmatpush.msra.mxu3 %v904_v4  ;;  %v29_v31 = vld [vmem:[%s1043_s2] sm:$0xf]  ;;  %vm224_vm1 = vcmask 1043456   ;;  %vm220_vm2 = vcmask 31744   ;;  %s855_s2 = smov 4   ;;  %vm760_vm9 = vcmask 58368  }
   0x8   :  { %v947_v19 = vand.u32 4294901760, %v932_v14  ;;  %121 = vmatpush.msra.mxu2 %v925_v11  ;;  %v78_v20 = vsub.f32 %v921_v10, %v937_v15  ;;  %51 = vmatpush.msra.mxu0 %v906_v5  ;;  %v84_v21 = vsub.f32 %v925_v11, %v940_v16  ;;  %v90_v22 = vsub.f32 %v929_v12, %v943_v18  ;;  %s857_s14 = smov [#allocation2]   ;;  %s769_s18 = sshll.u32 %s1046_s5, 4  ;;  %s770_s18 = int_to_ptr.hbm [resolvable:$true] %s769_s18 }
   0x9   :  { %v56_v23 = vand.u32 4294901760, %v55_v17  ;;  %151 = vmatpush.msra.mxu3 %v906_v5  ;;  %v226_v32 = vsel %vm224_vm1, %v29_v31, 0  ;;  %s767_s15 = sshll.u32 %s857_s14, 4  ;;  %vm753_vm10 = vcmask 254976   ;;  %s768_s15 = int_to_ptr.vmem [resolvable:$true] %s767_s15 }
   0xa   :  { %v79_v24 = vand.u32 4294901760, %v78_v20  ;;  %124 = vmatpush.msra.mxu2 %v929_v12  ;;  %v85_v25 = vand.u32 4294901760, %v84_v21  ;;  %53 = vmatpush.msra.mxu0 %v916_v8  ;;  %v96_v27 = vsub.f32 %v932_v14, %v947_v19  ;;  %v91_v28 = vand.u32 4294901760, %v90_v22 }
   0xb   :  { %v57_v26 = vsub.f32 %v55_v17, %v56_v23  ;;  %153 = vmatpush.msra.mxu3 %v916_v8  ;;  %v975_v33 = vand.u32 4294901760, %v226_v32 }
   0xc   :  { %176 = vmatpush.msrb.mxu0 %v937_v15  ;;  %80 = vmatpush.msra.mxu1 %v79_v24  ;;  %v97_v30 = vand.u32 4294901760, %v96_v27 }
   0xd   :  { %127 = vmatpush.msra.mxu2 %v932_v14  ;;  %v58_v29 = vand.u32 4294901760, %v57_v26  ;;  %157 = vmatmul.f32.vlgmr.msra.gmra.mxu3 %v56_v23  ;;  %v978_v34 = vsub.f32 %v226_v32, %v975_v33 }
   0xe   :  { %130 = vmatmul.f32.vlgmr.msra.gmra.mxu2 %v55_v17  ;;  %86 = vmatpush.msra.mxu1 %v85_v25 }
   0xf   :  { %59 = vmatmul.f32.vlgmr.msra.gmra.mxu0 %v58_v29  ;;  %244 = vmatpush.msrb.mxu2 %v975_v33  ;;  %v983_v35 = vand.u32 4294901760, %v978_v34 }
  0x10   :  { %180 = vmatpush.msrb.mxu0 %v940_v16  ;;  %92 = vmatpush.msra.mxu1 %v91_v28 }
  0x11   :  { %v272_v36 = vsub.f32 %v978_v34, %v983_v35  ;;  %346 = vmatpush.msra.mxu2 %v983_v35 }
  0x12   :  { %184 = vmatpush.msrb.mxu0 %v943_v18  ;;  %98 = vmatpush.msra.mxu1 %v97_v30 }
  0x13   :  { %100 = vmatmul.f32.vlgmr.msra.gmra.mxu1 %v54_v13  ;;  %v273_v37 = vand.u32 4294901760, %v272_v36 }
  0x14   :  { %188 = vmatpush.msrb.mxu0 %v947_v19  ;;  %207 = vmatpush.msrb.mxu1 %v902_v3 }
  0x15   :  { %274 = vmatpush.msrb.mxu3 %v273_v37 }
  0x16   :  { %209 = vmatpush.msrb.mxu1 %v904_v4  ;;  %297 = vmatpush.msra.mxu0 %v978_v34 }
  0x17   :  { %190 = vmatmul.f32.vlgmr.msrb.gmra.mxu0 %v54_v13  ;;  %368 = vmatpush.msra.mxu3 %v975_v33 }
  0x18   :  { %211 = vmatpush.msrb.mxu1 %v906_v5  ;;  %392 = vmatpush.msrb.mxu0 %v902_v3 }
  0x1a   :  { %213 = vmatpush.msrb.mxu1 %v916_v8  ;;  %394 = vmatpush.msrb.mxu0 %v904_v4 }
  0x1b   :  { %215 = vmatmul.f32.vlgmr.msrb.gmra.mxu1 %v54_v13 }
  0x1c   :  { %320 = vmatpush.msra.mxu1 %v975_v33  ;;  %396 = vmatpush.msrb.mxu0 %v906_v5 }
  0x1e   :  { %425 = vmatpush.msrb.mxu1 %v79_v24  ;;  %398 = vmatpush.msrb.mxu0 %v916_v8 }
  0x20   :  { %431 = vmatpush.msrb.mxu1 %v85_v25 }
  0x22   :  { %437 = vmatpush.msrb.mxu1 %v91_v28 }
  0x24   :  { %443 = vmatpush.msrb.mxu1 %v97_v30 }
  0x8c   :  { %v60_v38 = vpop.f32.mrf.mxu0 }
  0x90   :  { %v101_v39 = vpop.f32.mrf.mxu1  ;;  %v158_v42 = vpop.f32.mrf.mxu3 }
  0x91   :  { %v131_v40 = vpop.f32.mrf.mxu2  ;;  %v102_v41 = vadd.f32 %v101_v39, %v60_v38 }
  0x93   :  { %v132_v43 = vadd.f32 %v131_v40, %v102_v41  ;;  %v797_v41 = vld [vmem:[%s1044_s3] ss:$0 sm:$0xff]  ;;  %s856_s3 = smov [#allocation4]  }
  0x94   :  { %v191_v44 = vpop.f32.mrf.mxu0  ;;  %s778_s9 = sshll.u32 %s856_s3, 4  ;;  %s779_s9 = int_to_ptr.vmem [resolvable:$true] %s778_s9 }
  0x95   :  { %v159_v45 = vadd.f32 %v158_v42, %v132_v43 }
  0x97   :  { %v192_v46 = vadd.f32 %v191_v44, %v159_v45 }
  0x98   :  { %v216_v47 = vpop.f32.mrf.mxu1 }
  0x99   :  { %v217_v48 = vadd.f32 %v216_v47, %v192_v46 }
  0x9b   :  { %v994_v49 = vmul.f32 0.125, %v217_v48 }
  0x9d   :  { %v222_v50 = vsel %vm220_vm2, %v994_v49, 0 }
  0x9e   :  { %v245_v51 = vand.u32 4294901760, %v222_v50 }
  0xa0   :  { %v246_v52 = vsub.f32 %v222_v50, %v245_v51  ;;  %276 = vmatmul.f32.vlgmr.msrb.gmra.mxu3 %v245_v51 }
  0xa1   :  { %492 = vmatpush.msrb.mxu3 %v902_v3 }
  0xa2   :  { %300 = vmatmul.f32.vlgmr.msra.gmra.mxu0 %v246_v52  ;;  %v247_v53 = vand.u32 4294901760, %v246_v52 }
  0xa3   :  { %494 = vmatpush.msrb.mxu3 %v904_v4  ;;  %521 = vmatpush.msra.mxu0 %v937_v15 }
  0xa4   :  { %324 = vmatmul.f32.vlgmr.msra.gmra.mxu1 %v247_v53  ;;  %v248_v54 = vsub.f32 %v246_v52, %v247_v53 }
  0xa5   :  { %496 = vmatpush.msrb.mxu3 %v906_v5  ;;  %552 = vmatpush.msra.mxu1 %v902_v3 }
  0xa6   :  { %v249_v55 = vand.u32 4294901760, %v248_v54  ;;  %525 = vmatpush.msra.mxu0 %v940_v16 }
  0xa7   :  { %498 = vmatpush.msrb.mxu3 %v916_v8  ;;  %554 = vmatpush.msra.mxu1 %v904_v4 }
  0xa8   :  { %250 = vmatmul.f32.vlgmr.msrb.gmra.mxu2 %v249_v55  ;;  %370 = vmatmul.f32.vlgmr.msra.gmra.mxu3 %v245_v51 }
  0xa9   :  { %463 = vmatpush.msrb.mxu2 %v921_v10  ;;  %556 = vmatpush.msra.mxu1 %v906_v5 }
  0xaa   :  { %529 = vmatpush.msra.mxu0 %v943_v18  ;;  %647 = vmatpush.msra.mxu3 %v273_v37 }
  0xab   :  { %466 = vmatpush.msrb.mxu2 %v925_v11  ;;  %558 = vmatpush.msra.mxu1 %v916_v8 }
  0xac   :  { %533 = vmatpush.msra.mxu0 %v947_v19 }
  0xad   :  { %469 = vmatpush.msrb.mxu2 %v929_v12 }
  0xaf   :  { %472 = vmatpush.msrb.mxu2 %v932_v14 }
  0xb0   :  { %348 = vmatmul.f32.vlgmr.msra.gmra.mxu2 %v245_v51 }
  0xb1   :  { %617 = vmatpush.msra.mxu2 %v975_v33 }
 0x11f   :  { %v301_v59 = vpop.f32.mrf.mxu0 }
 0x121   :  { %v325_v61 = vpop.f32.mrf.mxu1 }
 0x123   :  { %v277_v56 = vpop.f32.mrf.mxu3 }
 0x12b   :  { %v251_v57 = vpop.f32.mrf.mxu2  ;;  %v371_v1 = vpop.f32.mrf.mxu3 }
 0x12c   :  { %v278_v58 = vadd.f32 %v277_v56, %v251_v57 }
 0x12e   :  { %v302_v60 = vadd.f32 %v301_v59, %v278_v58 }
 0x130   :  { %v326_v62 = vadd.f32 %v325_v61, %v302_v60 }
 0x133   :  { %v349_v63 = vpop.f32.mrf.mxu2 }
 0x134   :  { %v350_v0 = vadd.f32 %v349_v63, %v326_v62 }
 0x136   :  { %v372_v2 = vadd.f32 %v371_v1, %v350_v0 }
 0x138   :  { %v1016_v3 = vsub.f32 %v914_v7, %v372_v2  ;;  %v798_v2 = vld [vmem:[%s1045_s4] ss:$0 sm:$0xff] }
 0x13a   :  { %v375_v4 = vmul.f32 %v1016_v3, %v1016_v3 }
 0x13c   :  { %v377_v5 = vsel %vm30_vm0, %v375_v4, 0 }
 0x13d   :  { %v399_v6 = vand.u32 4294901760, %v377_v5 }
 0x13f   :  { %445 = vmatmul.f32.vlgmr.msrb.gmra.mxu1 %v399_v6  ;;  %v400_v8 = vsub.f32 %v377_v5, %v399_v6 }
 0x140   :  { %693 = vmatpush.msrb.mxu1 %v975_v33 }
 0x141   :  { %475 = vmatmul.f32.vlgmr.msrb.gmra.mxu2 %v400_v8  ;;  %v401_v9 = vand.u32 4294901760, %v400_v8 }
 0x142   :  { %719 = vmatpush.msrb.mxu2 %v983_v35 }
 0x143   :  { %502 = vmatmul.f32.vlgmr.msrb.gmra.mxu3 %v401_v9  ;;  %v402_v10 = vsub.f32 %v400_v8, %v401_v9 }
 0x144   :  { %741 = vmatpush.msrb.mxu3 %v975_v33 }
 0x145   :  { %v403_v7 = vand.u32 4294901760, %v402_v10 }
 0x147   :  { %404 = vmatmul.f32.vlgmr.msrb.gmra.mxu0 %v403_v7  ;;  %560 = vmatmul.f32.vlgmr.msra.gmra.mxu1 %v399_v6 }
 0x148   :  { %670 = vmatpush.msrb.mxu0 %v978_v34 }
 0x14f   :  { %535 = vmatmul.f32.vlgmr.msra.gmra.mxu0 %v399_v6 }
 0x1bc   :  { %v446_v11 = vpop.f32.mrf.mxu1 }
 0x1c4   :  { %v405_v12 = vpop.f32.mrf.mxu0  ;;  %v476_v14 = vpop.f32.mrf.mxu2 }
 0x1c5   :  { %v447_v13 = vadd.f32 %v446_v11, %v405_v12  ;;  %v561_v20 = vpop.f32.mrf.mxu1 }
 0x1c6   :  { %v503_v16 = vpop.f32.mrf.mxu3 }
 0x1c7   :  { %v477_v15 = vadd.f32 %v476_v14, %v447_v13 }
 0x1c9   :  { %v504_v17 = vadd.f32 %v503_v16, %v477_v15 }
 0x1cc   :  { %v536_v18 = vpop.f32.mrf.mxu0 }
 0x1cd   :  { %v537_v19 = vadd.f32 %v536_v18, %v504_v17 }
 0x1cf   :  { %v562_v21 = vadd.f32 %v561_v20, %v537_v19 }
 0x1d1   :  { %v564_v22 = vmul.f32 0.125, %v562_v21 }
 0x1d3   :  { %v565_v23 = vadd.f32 1e-05, %v564_v22 }
 0x1d5   :  { %799 = vrsqrt.f32 %v565_v23  ;;  %vm573_vm3 = vcmp.eq.f32.partialorder %v565_v23, inf  ;;  %v576_v31 = vand.u32 2147483648, %v565_v23  ;;  %vm575_vm4 = vcmp.eq.f32.partialorder %v565_v23, 0.0 }
 0x1db   :  { %v800_v24 = vpop.eup %799 }
 0x1dc   :  { %v567_v25 = vmul.f32 %v800_v24, %v565_v23 }
 0x1de   :  { %v568_v26 = vmul.f32 %v800_v24, %v567_v25 }
 0x1e0   :  { %v569_v27 = vmul.f32 0.5, %v568_v26 }
 0x1e2   :  { %v570_v28 = vsub.f32 1.5, %v569_v27 }
 0x1e4   :  { %v571_v29 = vmul.f32 %v800_v24, %v570_v28 }
 0x1e6   :  { %v572_v30 = vmul.f32 %v571_v29, %v565_v23 }
 0x1e8   :  { %v574_v32 = vsel %vm573_vm3, %v565_v23, %v572_v30 }
 0x1e9   :  { %v577_v33 = vsel %vm575_vm4, %v576_v31, %v574_v32 }
 0x1ea   :  { %801 = vrcp.f32 %v577_v33  ;;  %756 = vrot.lane.b32.xlu0 %v577_v33, %s855_s2  ;;  %v590_v37 = vand.u32 2147483648, %v577_v33  ;;  %v588_v39 = vand.u32 2147483647, %v577_v33  ;;  %vm584_vm6 = vweird.f32 %v577_v33 }
 0x1ec   :  { %v591_v42 = vor.u32 1.1754944e-38, %v590_v37  ;;  %vm589_vm8 = vcmp.eq.f32.partialorder %v588_v39, 8.507059e+37 }
 0x1f0   :  { %v802_v34 = vpop.eup %801 }
 0x1f1   :  { %v580_v35 = vmul.f32 %v802_v34, %v577_v33  ;;  %vm585_vm5 = vweird.f32 %v802_v34 }
 0x1f2   :  { %vm586_vm7 = vmor %vm584_vm6, %vm585_vm5 }
 0x1f3   :  { %v581_v36 = vsub.f32 1.0, %v580_v35 }
 0x1f5   :  { %v582_v38 = vmul.f32 %v802_v34, %v581_v36 }
 0x1f7   :  { %v583_v40 = vadd.f32 %v802_v34, %v582_v38 }
 0x1f9   :  { %v587_v43 = vsel %vm586_vm7, %v802_v34, %v583_v40 }
 0x1fa   :  { %v592_v44 = vsel %vm589_vm8, %v591_v42, %v587_v43 }
 0x1fb   :  { %v597_v45 = vmul.f32 %v797_v41, %v592_v44 }
 0x1fd   :  { %v599_v46 = vsel %vm220_vm2, %v597_v45, 0 }
 0x1fe   :  { %v618_v47 = vand.u32 4294901760, %v599_v46 }
 0x200   :  { %649 = vmatmul.f32.vlgmr.msra.gmra.mxu3 %v618_v47  ;;  %v619_v48 = vsub.f32 %v599_v46, %v618_v47 }
 0x202   :  { %673 = vmatmul.f32.vlgmr.msrb.gmra.mxu0 %v619_v48  ;;  %v620_v50 = vand.u32 4294901760, %v619_v48 }
 0x204   :  { %697 = vmatmul.f32.vlgmr.msrb.gmra.mxu1 %v620_v50  ;;  %v621_v51 = vsub.f32 %v619_v48, %v620_v50 }
 0x206   :  { %v622_v52 = vand.u32 4294901760, %v621_v51 }
 0x208   :  { %623 = vmatmul.f32.vlgmr.msra.gmra.mxu2 %v622_v52  ;;  %743 = vmatmul.f32.vlgmr.msrb.gmra.mxu3 %v618_v47 }
 0x210   :  { %721 = vmatmul.f32.vlgmr.msrb.gmra.mxu2 %v618_v47 }
 0x25c   :  { %v757_v53 = vpop.permute.xlu0 %756 }
 0x25d   :  { %v759_v54 = vsel %vm220_vm2, %v994_v49, %v757_v53 }
 0x25e   :  { %761 = vst.msk [vmem:[#allocation4] sm:$0x3] %vm760_vm9, %v759_v54 }
 0x25f   :  { %783 = dma.vmem_to_hbm [thread:$0]  %s779_s9, 32, %s781_s12, [#allocation5]  }
 0x27f   :  { %v674_v58 = vpop.f32.mrf.mxu0 }
 0x281   :  { %v698_v60 = vpop.f32.mrf.mxu1 }
 0x283   :  { %v650_v55 = vpop.f32.mrf.mxu3 }
 0x28b   :  { %v624_v56 = vpop.f32.mrf.mxu2  ;;  %v744_v0 = vpop.f32.mrf.mxu3 }
 0x28c   :  { %v651_v57 = vadd.f32 %v650_v55, %v624_v56 }
 0x28e   :  { %v675_v59 = vadd.f32 %v674_v58, %v651_v57 }
 0x290   :  { %v699_v61 = vadd.f32 %v698_v60, %v675_v59 }
 0x293   :  { %v722_v62 = vpop.f32.mrf.mxu2 }
 0x294   :  { %v723_v63 = vadd.f32 %v722_v62, %v699_v61 }
 0x296   :  { %v745_v1 = vadd.f32 %v744_v0, %v723_v63 }
 0x298   :  { %v747_v49 = vmul.f32 %v745_v1, %v1016_v3 }
 0x29a   :  { %v752_v4 = vadd.f32 %v798_v2, %v747_v49 }
 0x29c   :  { %754 = vst.msk [vmem:[#allocation2] sm:$0x3] %vm753_vm10, %v752_v4 }
 0x29d   :  { %772 = dma.vmem_to_hbm [thread:$0]  %s768_s15, 32, %s770_s18, [#allocation3]  }
 0x29e   :  { %851 = dma.done.wait [#allocation3], 32  }
 0x29f   :  { %852 = vsyncadd [#allocation3], 4294967264 }
 0x2a0   :  { %853 = dma.done.wait [#allocation5], 32  }
 0x2a1   :  { %854 = vsyncadd [#allocation5], 4294967264 }
 0x2a2   :  { %792 = vsyncpa [#allocation3], 1 }
 0x2a3   :  { %793 = vsyncpa [#allocation5], 1 }

</bundles_post_ra>
